<compile_context>
chip_gen: v5e
topology: v5e:2x2
jax: 0.10.0
libtpu: 0.0.40
codegen_flags: <defaults>
</compile_context>

<pallas_src>
import jax
import jax.numpy as jnp
from jax.experimental import pallas as pl
from jax.experimental.pallas import tpu as pltpu

H1 = 50
H2 = 25


def _round_up(a, b):
    return ((a + b - 1) // b) * b


def mlp_kernel(x_ref, w1_ref, b1_ref, w2_ref, b2_ref, w3_ref, b3_ref, out_ref):
    # x_ref: (TM, F) bf16 batch tile.  w*_ref: resident bf16 weights (constant
    # index_map).  b*_ref: f32 biases, broadcast over the TM rows.  All matmuls
    # accumulate in f32 on the MXU.
    h1 = jnp.dot(x_ref[...], w1_ref[...], preferred_element_type=jnp.float32)
    h1 = jnp.maximum(h1 + b1_ref[...], 0.0)                      # ReLU

    h2 = jnp.dot(h1.astype(jnp.bfloat16), w2_ref[...],
                 preferred_element_type=jnp.float32)
    h2 = jnp.maximum(h2 + b2_ref[...], 0.0)                      # ReLU

    logits = jnp.dot(h2.astype(jnp.bfloat16), w3_ref[...],
                     preferred_element_type=jnp.float32)
    out_ref[...] = logits + b3_ref[...]                          # (TM, 128) f32, unmasked store


def prepare_params(params):
    """One-time layout prep (keep OUT of the per-call path):
       - transpose nn.Linear weights (out,in) -> (in,out) for lane-dense matmuls
       - cast weights to bf16 (biases stay f32; accumulation stays f32 in-kernel)
       - zero-pad the last layer to a 128-lane-dense output slab
    """
    num_classes = params["w3"].shape[0]
    c_pad = max(128, _round_up(num_classes, 128))
    w3 = jnp.pad(params["w3"].T, ((0, 0), (0, c_pad - num_classes)))          # (H2, c_pad)
    b3 = jnp.pad(params["b3"].reshape(1, -1), ((0, 0), (0, c_pad - num_classes)))
    return {
        "w1": params["w1"].T.astype(jnp.bfloat16),                            # (F, 50)
        "b1": params["b1"].reshape(1, -1).astype(jnp.float32),                # (1, 50)
        "w2": params["w2"].T.astype(jnp.bfloat16),                            # (50, 25)
        "b2": params["b2"].reshape(1, -1).astype(jnp.float32),                # (1, 25)
        "w3": w3.astype(jnp.bfloat16),                                        # (25, c_pad)
        "b3": b3.astype(jnp.float32),                                         # (1, c_pad)
        "num_classes": num_classes,
    }


def pytorch_mlp_forward(x, prepped, tm=512):
    """x: (B, C, H, W) or (B, F).  prepped: output of prepare_params."""
    B = x.shape[0]
    num_classes = prepped["num_classes"]
    c_pad = prepped["w3"].shape[1]
    F = prepped["w1"].shape[0]

    # torch.flatten(x, start_dim=1) + bf16 cast (halves the dominant x HBM bytes).
    x2d = x.reshape(B, -1).astype(jnp.bfloat16)
    assert x2d.shape[1] == F, "input feature count does not match the weights"

    # Batch tile: multiple of 8 sublanes; big enough to sit near the HBM roofline
    # while the double-buffered footprint stays far below v7x's 64 MiB VMEM.
    tm = max(8, min(_round_up(tm, 8), _round_up(B, 8)))
    b_pad = _round_up(B, tm)
    if b_pad != B:
        # Pad the ragged last batch tile (padded rows are sliced off below).
        x2d = jnp.pad(x2d, ((0, b_pad - B), (0, 0)))
    n_tiles = b_pad // tm

    # Explicit VMEM budget: double-buffered x/out tiles + resident weights + headroom.
    # Floor at 16 MiB (v5e default scoped limit), ceiling well under v7x's 64 MiB.
    weight_bytes = (F * H1 + H1 * H2 + H2 * c_pad) * 2 + (H1 + H2 + c_pad) * 4
    tile_bytes = 2 * (tm * F * 2) + 2 * (tm * c_pad * 4)
    vmem_limit = int(min(max(tile_bytes + 2 * weight_bytes + (4 << 20), 16 << 20),
                         48 << 20))

    # NOTE: weights could additionally use pipeline_mode=pl.Buffered(1) to skip
    # double-buffering; omitted since they are <~150 KB total and always revisit
    # block (0, 0), so Pallas keeps them resident anyway.
    out = pl.pallas_call(
        mlp_kernel,
        out_shape=jax.ShapeDtypeStruct((b_pad, c_pad), jnp.float32),
        grid_spec=pltpu.PrefetchScalarGridSpec(
            num_scalar_prefetch=0,
            grid=(n_tiles,),
            in_specs=[
                pl.BlockSpec((tm, F), lambda i: (i, 0)),        # x tile (pipelined)
                pl.BlockSpec((F, H1), lambda i: (0, 0)),        # resident weights
                pl.BlockSpec((1, H1), lambda i: (0, 0)),
                pl.BlockSpec((H1, H2), lambda i: (0, 0)),
                pl.BlockSpec((1, H2), lambda i: (0, 0)),
                pl.BlockSpec((H2, c_pad), lambda i: (0, 0)),
                pl.BlockSpec((1, c_pad), lambda i: (0, 0)),
            ],
            out_specs=pl.BlockSpec((tm, c_pad), lambda i: (i, 0)),
        ),
        compiler_params=pltpu.CompilerParams(
            dimension_semantics=("parallel",),   # shard batch tiles across v7x's 2 TCs
            vmem_limit_bytes=vmem_limit,
        ),
    )(x2d, prepped["w1"], prepped["b1"], prepped["w2"], prepped["b2"],
      prepped["w3"], prepped["b3"])

    return out[:B, :num_classes]


def init_params(key, num_features, num_classes):
    """Deterministic init mimicking nn.Linear's U(-1/sqrt(fan_in), 1/sqrt(fan_in))."""
    keys = jax.random.split(key, 6)

    def linear(kw, kb, fan_in, fan_out):
        bound = 1.0 / jnp.sqrt(jnp.float32(fan_in))
        w = jax.random.uniform(kw, (fan_out, fan_in), jnp.float32, -bound, bound)
        b = jax.random.uniform(kb, (fan_out,), jnp.float32, -bound, bound)
        return w, b

    w1, b1 = linear(keys[0], keys[1], num_features, H1)
    w2, b2 = linear(keys[2], keys[3], H1, H2)
    w3, b3 = linear(keys[4], keys[5], H2, num_classes)
    return {"w1": w1, "b1": b1, "w2": w2, "b2": b2, "w3": w3, "b3": b3}


if __name__ == "__main__":
    key = jax.random.PRNGKey(0)
    k_x, k_p = jax.random.split(key)

    # Small example input consistent with torch.flatten(start_dim=1): B=2, C=4, 16x16.
    B, C, H, W = 2, 4, 16, 16
    num_features = C * H * W
    num_classes = 8

    x = jax.random.normal(k_x, (B, C, H, W), dtype=jnp.float32)
    params = init_params(k_p, num_features, num_classes)
    prepped = prepare_params(params)

    logits = pytorch_mlp_forward(x, prepped)
    jax.block_until_ready(logits)
    assert logits.shape == (B, num_classes)

    # Reference in plain JAX with the same bf16 input/weight quantization and f32
    # accumulation (matches the kernel's numerics; torch-f32 differs by ~1e-2 rel).
    x2d = x.reshape(B, -1)
    w1b = params["w1"].T.astype(jnp.bfloat16)
    w2b = params["w2"].T.astype(jnp.bfloat16)
    w3b = params["w3"].T.astype(jnp.bfloat16)
    h1 = jnp.maximum(jnp.dot(x2d.astype(jnp.bfloat16), w1b,
                             preferred_element_type=jnp.float32) + params["b1"], 0.0)
    h2 = jnp.maximum(jnp.dot(h1.astype(jnp.bfloat16), w2b,
                             preferred_element_type=jnp.float32) + params["b2"], 0.0)
    ref = jnp.dot(h2.astype(jnp.bfloat16), w3b,
                  preferred_element_type=jnp.float32) + params["b3"]
    assert jnp.allclose(logits, ref, atol=1e-2, rtol=1e-2)

    print("KERNEL_OK")
</pallas_src>

<mosaic_0001>
module attributes {stable_mosaic.version = 11 : i64} {
  func.func @mlp_kernel(%arg0: i32, %arg1: memref<8x1024xbf16, #tpu.memory_space<vmem>>, %arg2: memref<1024x50xbf16, #tpu.memory_space<vmem>>, %arg3: memref<1x50xf32, #tpu.memory_space<vmem>>, %arg4: memref<50x25xbf16, #tpu.memory_space<vmem>>, %arg5: memref<1x25xf32, #tpu.memory_space<vmem>>, %arg6: memref<25x128xbf16, #tpu.memory_space<vmem>>, %arg7: memref<1x128xf32, #tpu.memory_space<vmem>>, %arg8: memref<8x128xf32, #tpu.memory_space<vmem>>) attributes {dimension_semantics = [#tpu.dimension_semantics<parallel>], iteration_bounds = array<i64: 1>, scalar_prefetch = 0 : i64, scratch_operands = 0 : i64, tpu.core_type = #tpu.core_type<tc>, window_params = [{transform_indices = @transform_0, window_bounds = array<i64: 8, 1024>}, {pipeline_mode = #tpu.pipeline_mode<synchronous>, transform_indices = @transform_1, window_bounds = array<i64: 1024, 50>}, {pipeline_mode = #tpu.pipeline_mode<synchronous>, transform_indices = @transform_2, window_bounds = array<i64: 1, 50>}, {pipeline_mode = #tpu.pipeline_mode<synchronous>, transform_indices = @transform_3, window_bounds = array<i64: 50, 25>}, {pipeline_mode = #tpu.pipeline_mode<synchronous>, transform_indices = @transform_4, window_bounds = array<i64: 1, 25>}, {pipeline_mode = #tpu.pipeline_mode<synchronous>, transform_indices = @transform_5, window_bounds = array<i64: 25, 128>}, {pipeline_mode = #tpu.pipeline_mode<synchronous>, transform_indices = @transform_6, window_bounds = array<i64: 1, 128>}, {transform_indices = @transform_7, window_bounds = array<i64: 8, 128>}]} {
    %c0 = arith.constant 0 : index
    %c0_0 = arith.constant 0 : index
    %0 = vector.load %arg1[%c0, %c0_0] : memref<8x1024xbf16, #tpu.memory_space<vmem>>, vector<8x1024xbf16>
    %c0_1 = arith.constant 0 : index
    %c0_2 = arith.constant 0 : index
    %1 = vector.load %arg2[%c0_1, %c0_2] : memref<1024x50xbf16, #tpu.memory_space<vmem>>, vector<1024x50xbf16>
    %cst = arith.constant dense<0.000000e+00> : vector<8x50xf32>
    %2 = tpu.matmul %0, %1, %cst {dimension_numbers = #tpu.dot_dimension_numbers<[1], [0], [0], [1], [0, 0, 1, 1], [], []>} : vector<8x1024xbf16>, vector<1024x50xbf16>, vector<8x50xf32> -> vector<8x50xf32>
    %c0_3 = arith.constant 0 : index
    %c0_4 = arith.constant 0 : index
    %3 = vector.load %arg3[%c0_3, %c0_4] : memref<1x50xf32, #tpu.memory_space<vmem>>, vector<1x50xf32>
    %4 = vector.broadcast %3 : vector<1x50xf32> to vector<8x50xf32>
    %5 = arith.addf %2, %4 : vector<8x50xf32>
    %cst_5 = arith.constant 0.000000e+00 : f32
    %6 = vector.broadcast %cst_5 : f32 to vector<8x50xf32>
    %7 = arith.maximumf %5, %6 : vector<8x50xf32>
    %8 = arith.truncf %7 : vector<8x50xf32> to vector<8x50xbf16>
    %c0_6 = arith.constant 0 : index
    %c0_7 = arith.constant 0 : index
    %9 = vector.load %arg4[%c0_6, %c0_7] : memref<50x25xbf16, #tpu.memory_space<vmem>>, vector<50x25xbf16>
    %cst_8 = arith.constant dense<0.000000e+00> : vector<8x25xf32>
    %10 = tpu.matmul %8, %9, %cst_8 {dimension_numbers = #tpu.dot_dimension_numbers<[1], [0], [0], [1], [0, 0, 1, 1], [], []>} : vector<8x50xbf16>, vector<50x25xbf16>, vector<8x25xf32> -> vector<8x25xf32>
    %c0_9 = arith.constant 0 : index
    %c0_10 = arith.constant 0 : index
    %11 = vector.load %arg5[%c0_9, %c0_10] : memref<1x25xf32, #tpu.memory_space<vmem>>, vector<1x25xf32>
    %12 = vector.broadcast %11 : vector<1x25xf32> to vector<8x25xf32>
    %13 = arith.addf %10, %12 : vector<8x25xf32>
    %cst_11 = arith.constant 0.000000e+00 : f32
    %14 = vector.broadcast %cst_11 : f32 to vector<8x25xf32>
    %15 = arith.maximumf %13, %14 : vector<8x25xf32>
    %16 = arith.truncf %15 : vector<8x25xf32> to vector<8x25xbf16>
    %c0_12 = arith.constant 0 : index
    %c0_13 = arith.constant 0 : index
    %17 = vector.load %arg6[%c0_12, %c0_13] : memref<25x128xbf16, #tpu.memory_space<vmem>>, vector<25x128xbf16>
    %cst_14 = arith.constant dense<0.000000e+00> : vector<8x128xf32>
    %18 = tpu.matmul %16, %17, %cst_14 {dimension_numbers = #tpu.dot_dimension_numbers<[1], [0], [0], [1], [0, 0, 1, 1], [], []>} : vector<8x25xbf16>, vector<25x128xbf16>, vector<8x128xf32> -> vector<8x128xf32>
    %c0_15 = arith.constant 0 : index
    %c0_16 = arith.constant 0 : index
    %19 = vector.load %arg7[%c0_15, %c0_16] : memref<1x128xf32, #tpu.memory_space<vmem>>, vector<1x128xf32>
    %20 = vector.broadcast %19 : vector<1x128xf32> to vector<8x128xf32>
    %21 = arith.addf %18, %20 : vector<8x128xf32>
    %c0_17 = arith.constant 0 : index
    %c0_18 = arith.constant 0 : index
    %22 = vector.load %arg8[%c0_17, %c0_18] : memref<8x128xf32, #tpu.memory_space<vmem>>, vector<8x128xf32>
    tpu.vector_store %arg8[%c0_17, %c0_18], %21 {strides = array<i32>} : memref<8x128xf32, #tpu.memory_space<vmem>>, vector<8x128xf32>,
    return
  }
  func.func @transform_0(%arg0: i32) -> (i32, i32) {
    %c0_i32 = arith.constant 0 : i32
    %c0_i32_0 = arith.constant 0 : i32
    return %arg0, %c0_i32 : i32, i32
  }
  func.func @transform_1(%arg0: i32) -> (i32, i32) {
    %c0_i32 = arith.constant 0 : i32
    %c0_i32_0 = arith.constant 0 : i32
    %c0_i32_1 = arith.constant 0 : i32
    return %c0_i32, %c0_i32_0 : i32, i32
  }
  func.func @transform_2(%arg0: i32) -> (i32, i32) {
    %c0_i32 = arith.constant 0 : i32
    %c0_i32_0 = arith.constant 0 : i32
    %c0_i32_1 = arith.constant 0 : i32
    return %c0_i32, %c0_i32_0 : i32, i32
  }
  func.func @transform_3(%arg0: i32) -> (i32, i32) {
    %c0_i32 = arith.constant 0 : i32
    %c0_i32_0 = arith.constant 0 : i32
    %c0_i32_1 = arith.constant 0 : i32
    return %c0_i32, %c0_i32_0 : i32, i32
  }
  func.func @transform_4(%arg0: i32) -> (i32, i32) {
    %c0_i32 = arith.constant 0 : i32
    %c0_i32_0 = arith.constant 0 : i32
    %c0_i32_1 = arith.constant 0 : i32
    return %c0_i32, %c0_i32_0 : i32, i32
  }
  func.func @transform_5(%arg0: i32) -> (i32, i32) {
    %c0_i32 = arith.constant 0 : i32
    %c0_i32_0 = arith.constant 0 : i32
    %c0_i32_1 = arith.constant 0 : i32
    return %c0_i32, %c0_i32_0 : i32, i32
  }
  func.func @transform_6(%arg0: i32) -> (i32, i32) {
    %c0_i32 = arith.constant 0 : i32
    %c0_i32_0 = arith.constant 0 : i32
    %c0_i32_1 = arith.constant 0 : i32
    return %c0_i32, %c0_i32_0 : i32, i32
  }
  func.func @transform_7(%arg0: i32) -> (i32, i32) {
    %c0_i32 = arith.constant 0 : i32
    %c0_i32_0 = arith.constant 0 : i32
    return %arg0, %c0_i32 : i32, i32
  }
}

</mosaic_0001>

<bundles_post_ra>
// kernel: tpu_custom_call.1
= control target key start
LH: loop header
LB: loop body
LE: loop exit
PB: predicated region body
PF: predicated region fallthrough
CT: control target
= control target key end

     0   :  { %s1454_s0 = inlined_call_operand.vmem [shape: bf16[8,1024], index: 0, kind: input, shape index: {}]   ;;  %s1455_s1 = inlined_call_operand.vmem [shape: bf16[1024,50], index: 1, kind: input, shape index: {}]   ;;  %s1456_s2 = inlined_call_operand.vmem [shape: f32[1,50], index: 2, kind: input, shape index: {}]   ;;  %s1457_s3 = inlined_call_operand.vmem [shape: bf16[50,25], index: 3, kind: input, shape index: {}]   ;;  %s1458_s4 = inlined_call_operand.vmem [shape: f32[1,25], index: 4, kind: input, shape index: {}]   ;;  %s1459_s5 = inlined_call_operand.vmem [shape: bf16[25,128], index: 5, kind: input, shape index: {}]   ;;  %s1460_s6 = inlined_call_operand.vmem [shape: f32[1,128], index: 6, kind: input, shape index: {}]   ;;  %s1461_s7 = inlined_call_operand.hbm [shape: f32[8,128], index: 7, kind: output, shape index: {}]  }
   0x1   :  { %v1082_v0 = vld [vmem:[%s1455_s1 + $0x38] sm:$0xff]  ;;  %v1081_v4 = vld [vmem:[%s1455_s1 + $0x30] sm:$0xff]  ;;  %v1080_v8 = vld [vmem:[%s1455_s1 + $0x28] sm:$0xff] }
   0x2   :  { %v1090_v1 = vld [vmem:[%s1455_s1 + $0x78] sm:$0xff]  ;;  %576 = vmatpush.bf16.msra.mxu0 %v1082_v0  ;;  %v1089_v5 = vld [vmem:[%s1455_s1 + $0x70] sm:$0xff]  ;;  %v1088_v9 = vld [vmem:[%s1455_s1 + $0x68] sm:$0xff] }
   0x3   :  { %v1098_v2 = vld [vmem:[%s1455_s1 + $0xb8] sm:$0xff]  ;;  %589 = vmatpush.bf16.msra.mxu1 %v1090_v1  ;;  %v1097_v6 = vld [vmem:[%s1455_s1 + $0xb0] sm:$0xff]  ;;  %v1096_v10 = vld [vmem:[%s1455_s1 + $0xa8] sm:$0xff] }
   0x4   :  { %v1106_v3 = vld [vmem:[%s1455_s1 + $0xf8] sm:$0xff]  ;;  %602 = vmatpush.bf16.msra.mxu2 %v1098_v2  ;;  %v1105_v7 = vld [vmem:[%s1455_s1 + $0xf0] sm:$0xff]  ;;  %v1104_v11 = vld [vmem:[%s1455_s1 + $0xe8] sm:$0xff] }
   0x5   :  { %615 = vmatpush.bf16.msra.mxu3 %v1106_v3  ;;  %v1079_v12 = vld [vmem:[%s1455_s1 + $0x20] sm:$0xff]  ;;  %v1078_v16 = vld [vmem:[%s1455_s1 + $0x18] sm:$0xff]  ;;  %v1077_v20 = vld [vmem:[%s1455_s1 + $0x10] sm:$0xff] }
   0x6   :  { %577 = vmatpush.bf16.msra.mxu0 %v1081_v4  ;;  %v1087_v13 = vld [vmem:[%s1455_s1 + $0x60] sm:$0xff]  ;;  %v1086_v17 = vld [vmem:[%s1455_s1 + $0x58] sm:$0xff]  ;;  %v1085_v21 = vld [vmem:[%s1455_s1 + $0x50] sm:$0xff] }
   0x7   :  { %590 = vmatpush.bf16.msra.mxu1 %v1089_v5  ;;  %v1095_v14 = vld [vmem:[%s1455_s1 + $0xa0] sm:$0xff]  ;;  %v1094_v18 = vld [vmem:[%s1455_s1 + $0x98] sm:$0xff]  ;;  %v1093_v22 = vld [vmem:[%s1455_s1 + $0x90] sm:$0xff] }
   0x8   :  { %603 = vmatpush.bf16.msra.mxu2 %v1097_v6  ;;  %v1103_v15 = vld [vmem:[%s1455_s1 + $0xe0] sm:$0xff]  ;;  %v1102_v19 = vld [vmem:[%s1455_s1 + $0xd8] sm:$0xff]  ;;  %v1101_v23 = vld [vmem:[%s1455_s1 + $0xd0] sm:$0xff] }
   0x9   :  { %616 = vmatpush.bf16.msra.mxu3 %v1105_v7 }
   0xa   :  { %578 = vmatpush.bf16.msra.mxu0 %v1080_v8 }
   0xb   :  { %591 = vmatpush.bf16.msra.mxu1 %v1088_v9 }
   0xc   :  { %604 = vmatpush.bf16.msra.mxu2 %v1096_v10 }
   0xd   :  { %617 = vmatpush.bf16.msra.mxu3 %v1104_v11 }
   0xe   :  { %579 = vmatpush.bf16.msra.mxu0 %v1079_v12 }
   0xf   :  { %592 = vmatpush.bf16.msra.mxu1 %v1087_v13 }
  0x10   :  { %605 = vmatpush.bf16.msra.mxu2 %v1095_v14 }
  0x11   :  { %618 = vmatpush.bf16.msra.mxu3 %v1103_v15 }
  0x12   :  { %580 = vmatpush.bf16.msra.mxu0 %v1078_v16 }
  0x13   :  { %593 = vmatpush.bf16.msra.mxu1 %v1086_v17 }
  0x14   :  { %606 = vmatpush.bf16.msra.mxu2 %v1094_v18 }
  0x15   :  { %619 = vmatpush.bf16.msra.mxu3 %v1102_v19 }
  0x16   :  { %12 = vsyncpa [#allocation3], 0  ;;  %581 = vmatpush.bf16.msra.mxu0 %v1077_v20  ;;  %v1076_v24 = vld [vmem:[%s1455_s1 + $0x8] sm:$0xff]  ;;  %v28_v29 = vld [vmem:[%s1454_s0] sm:$0xff]  ;;  %vm718_vm0 = vcmask 1040384   ;;  %vm760_vm1 = vcmask 1043456  }
  0x17   :  { %594 = vmatpush.bf16.msra.mxu1 %v1085_v21  ;;  %v1084_v25 = vld [vmem:[%s1455_s1 + $0x48] sm:$0xff]  ;;  %v1075_v30 = vld [vmem:[%s1455_s1] sm:$0xff]  ;;  %v168_v33 = vunpack.c.l.b16 %v28_v29  ;;  %v169_v37 = vunpack.c.h.b16 %v28_v29  ;;  %v1114_v38 = vld [vmem:[%s1455_s1 + $0x138] sm:$0xff]  ;;  %vm761_vm2 = vcmask 1044480   ;;  %vm714_vm3 = vcmask 408576   ;;  %s1176_s14 = smov [#allocation2]  }
  0x18   :  { %v1092_v26 = vld [vmem:[%s1455_s1 + $0x88] sm:$0xff]  ;;  %607 = vmatpush.bf16.msra.mxu2 %v1093_v22  ;;  %v1083_v31 = vld [vmem:[%s1455_s1 + $0x40] sm:$0xff]  ;;  %v1122_v39 = vld [vmem:[%s1455_s1 + $0x178] sm:$0xff]  ;;  %vm756_vm4 = vcmask 203776   ;;  %s786_s15 = sshll.u32 %s1176_s14, 4  ;;  %s788_s18 = sshll.u32 %s1461_s7, 4  ;;  %s787_s15 = int_to_ptr.vmem [resolvable:$true] %s786_s15  ;;  %s789_s18 = int_to_ptr.hbm [resolvable:$true] %s788_s18 }
  0x19   :  { %620 = vmatpush.bf16.msra.mxu3 %v1101_v23  ;;  %v1100_v27 = vld [vmem:[%s1455_s1 + $0xc8] sm:$0xff]  ;;  %v1091_v34 = vld [vmem:[%s1455_s1 + $0x80] sm:$0xff]  ;;  %v1130_v40 = vld [vmem:[%s1455_s1 + $0x1b8] sm:$0xff]  ;;  %v176_v43 = vpack.c.b16 %v168_v33, %v168_v33  ;;  %v177_v45 = vpack.c.b16 %v169_v37, %v169_v37 }
  0x1a   :  { %v29_v28 = vld [vmem:[%s1454_s0 + $0x8] sm:$0xff]  ;;  %582 = vmatpush.bf16.msra.mxu0 %v1076_v24  ;;  %v1099_v35 = vld [vmem:[%s1455_s1 + $0xc0] sm:$0xff]  ;;  %v1138_v41 = vld [vmem:[%s1455_s1 + $0x1f8] sm:$0xff] }
  0x1b   :  { %595 = vmatpush.bf16.msra.mxu1 %v1084_v25  ;;  %v170_v32 = vunpack.c.l.b16 %v29_v28  ;;  %v171_v36 = vunpack.c.h.b16 %v29_v28  ;;  %v1113_v46 = vld [vmem:[%s1455_s1 + $0x130] sm:$0xff]  ;;  %v1112_v50 = vld [vmem:[%s1455_s1 + $0x128] sm:$0xff]  ;;  %v1111_v54 = vld [vmem:[%s1455_s1 + $0x120] sm:$0xff] }
  0x1c   :  { %608 = vmatpush.bf16.msra.mxu2 %v1092_v26  ;;  %v1121_v47 = vld [vmem:[%s1455_s1 + $0x170] sm:$0xff]  ;;  %v1120_v51 = vld [vmem:[%s1455_s1 + $0x168] sm:$0xff]  ;;  %v1119_v55 = vld [vmem:[%s1455_s1 + $0x160] sm:$0xff] }
  0x1d   :  { %621 = vmatpush.bf16.msra.mxu3 %v1100_v27  ;;  %v178_v42 = vpack.c.b16 %v170_v32, %v170_v32  ;;  %v179_v44 = vpack.c.b16 %v171_v36, %v171_v36  ;;  %v1129_v48 = vld [vmem:[%s1455_s1 + $0x1b0] sm:$0xff]  ;;  %v1128_v52 = vld [vmem:[%s1455_s1 + $0x1a8] sm:$0xff]  ;;  %v1127_v56 = vld [vmem:[%s1455_s1 + $0x1a0] sm:$0xff] }
  0x1e   :  { %583 = vmatpush.bf16.msra.mxu0 %v1075_v30  ;;  %v1137_v49 = vld [vmem:[%s1455_s1 + $0x1f0] sm:$0xff]  ;;  %v1136_v53 = vld [vmem:[%s1455_s1 + $0x1e8] sm:$0xff]  ;;  %v1135_v57 = vld [vmem:[%s1455_s1 + $0x1e0] sm:$0xff] }
  0x1f   :  { %596 = vmatpush.bf16.msra.mxu1 %v1083_v31  ;;  %v1110_v58 = vld [vmem:[%s1455_s1 + $0x118] sm:$0xff]  ;;  %v1109_v62 = vld [vmem:[%s1455_s1 + $0x110] sm:$0xff]  ;;  %v1108_v2 = vld [vmem:[%s1455_s1 + $0x108] sm:$0xff] }
  0x20   :  { %609 = vmatpush.bf16.msra.mxu2 %v1091_v34  ;;  %v1118_v59 = vld [vmem:[%s1455_s1 + $0x158] sm:$0xff]  ;;  %v1117_v63 = vld [vmem:[%s1455_s1 + $0x150] sm:$0xff]  ;;  %v1116_v3 = vld [vmem:[%s1455_s1 + $0x148] sm:$0xff] }
  0x21   :  { %622 = vmatpush.bf16.msra.mxu3 %v1099_v35  ;;  %584 = vmatmul.bf16.vlgmr.msra.gmra.mxu0 %v176_v43  ;;  %v1126_v60 = vld [vmem:[%s1455_s1 + $0x198] sm:$0xff]  ;;  %v1125_v0 = vld [vmem:[%s1455_s1 + $0x190] sm:$0xff]  ;;  %v1124_v5 = vld [vmem:[%s1455_s1 + $0x188] sm:$0xff] }
  0x22   :  { %628 = vmatpush.bf16.msrb.mxu0 %v1114_v38  ;;  %597 = vmatmul.bf16.vlgmr.msra.gmra.mxu1 %v177_v45  ;;  %v1134_v61 = vld [vmem:[%s1455_s1 + $0x1d8] sm:$0xff]  ;;  %v1133_v1 = vld [vmem:[%s1455_s1 + $0x1d0] sm:$0xff]  ;;  %v1132_v6 = vld [vmem:[%s1455_s1 + $0x1c8] sm:$0xff] }
  0x23   :  { %641 = vmatpush.bf16.msrb.mxu1 %v1122_v39  ;;  %610 = vmatmul.bf16.vlgmr.msra.gmra.mxu2 %v178_v42  ;;  %v30_v4 = vld [vmem:[%s1454_s0 + $0x10] sm:$0xff]  ;;  %v31_v7 = vld [vmem:[%s1454_s0 + $0x18] sm:$0xff]  ;;  %v1107_v10 = vld [vmem:[%s1455_s1 + $0x100] sm:$0xff]  ;;  %v1175_v39 = vmov 65535  }
  0x24   :  { %654 = vmatpush.bf16.msrb.mxu2 %v1130_v40  ;;  %623 = vmatmul.bf16.vlgmr.msra.gmra.mxu3 %v179_v44  ;;  %v172_v8 = vunpack.c.l.b16 %v30_v4  ;;  %v173_v9 = vunpack.c.h.b16 %v30_v4  ;;  %v1115_v11 = vld [vmem:[%s1455_s1 + $0x140] sm:$0xff]  ;;  %v174_v12 = vunpack.c.l.b16 %v31_v7  ;;  %v175_v13 = vunpack.c.h.b16 %v31_v7  ;;  %v688_v20 = vld [vmem:[%s1457_s3 + $0x18] sm:$0x1]  ;;  %v1141_v25 = vld [vmem:[%s1457_s3 + $0x10] sm:$0xff] }
  0x25   :  { %667 = vmatpush.bf16.msrb.mxu3 %v1138_v41  ;;  %v1123_v14 = vld [vmem:[%s1455_s1 + $0x180] sm:$0xff]  ;;  %v706_v21 = vunpack.c.l.b16 %v688_v20  ;;  %v1140_v27 = vld [vmem:[%s1457_s3 + $0x8] sm:$0xff]  ;;  %v762_v40 = vsel %vm760_vm1, 4294967295, %v1175_v39 }
  0x26   :  { %629 = vmatpush.bf16.msrb.mxu0 %v1113_v46  ;;  %v1131_v15 = vld [vmem:[%s1455_s1 + $0x1c0] sm:$0xff]  ;;  %v180_v16 = vpack.c.b16 %v172_v8, %v172_v8  ;;  %v181_v17 = vpack.c.b16 %v173_v9, %v173_v9  ;;  %v182_v18 = vpack.c.b16 %v174_v12, %v174_v12  ;;  %v183_v19 = vpack.c.b16 %v175_v13, %v175_v13  ;;  %v1072_v34 = vld [vmem:[%s1459_s5 + $0x8] sm:$0xf]  ;;  %v1143_v35 = vld [vmem:[%s1459_s5 + $0x8] sm:$0x10] }
  0x27   :  { %642 = vmatpush.bf16.msrb.mxu1 %v1121_v47  ;;  %v710_v22 = vpack.c.b16 %v706_v21, %v706_v21  ;;  %v1139_v31 = vld [vmem:[%s1457_s3] sm:$0xff]  ;;  %v1073_v37 = vor.u32 %v1143_v35, %v1072_v34  ;;  %v763_v41 = vsel %vm761_vm2, %v762_v40, 0 }
  0x28   :  { %655 = vmatpush.bf16.msrb.mxu2 %v1129_v48  ;;  %v1146_v33 = vld [vmem:[%s1456_s2] ss:$0 sm:$0xff] }
  0x29   :  { %668 = vmatpush.bf16.msrb.mxu3 %v1137_v49  ;;  %v720_v23 = vsel %vm718_vm0, %v710_v22, 0  ;;  %v765_v43 = vand.u32 %v1073_v37, %v763_v41  ;;  %v1142_v44 = vld [vmem:[%s1459_s5] sm:$0xff] }
  0x2a   :  { %630 = vmatpush.bf16.msrb.mxu0 %v1112_v50  ;;  %v1148_v4 = vld [vmem:[%s1460_s6] ss:$0 sm:$0xff] }
  0x2b   :  { %643 = vmatpush.bf16.msrb.mxu1 %v1120_v51 }
  0x2c   :  { %656 = vmatpush.bf16.msrb.mxu2 %v1128_v52 }
  0x2d   :  { %669 = vmatpush.bf16.msrb.mxu3 %v1136_v53 }
  0x2e   :  { %631 = vmatpush.bf16.msrb.mxu0 %v1111_v54 }
  0x2f   :  { %644 = vmatpush.bf16.msrb.mxu1 %v1119_v55 }
  0x30   :  { %657 = vmatpush.bf16.msrb.mxu2 %v1127_v56 }
  0x31   :  { %670 = vmatpush.bf16.msrb.mxu3 %v1135_v57 }
  0x32   :  { %632 = vmatpush.bf16.msrb.mxu0 %v1110_v58 }
  0x33   :  { %645 = vmatpush.bf16.msrb.mxu1 %v1118_v59 }
  0x34   :  { %658 = vmatpush.bf16.msrb.mxu2 %v1126_v60 }
  0x35   :  { %671 = vmatpush.bf16.msrb.mxu3 %v1134_v61 }
  0x36   :  { %633 = vmatpush.bf16.msrb.mxu0 %v1109_v62  ;;  %v1147_v62 = vld [vmem:[%s1458_s4] ss:$0 sm:$0xff] }
  0x37   :  { %646 = vmatpush.bf16.msrb.mxu1 %v1117_v63 }
  0x38   :  { %659 = vmatpush.bf16.msrb.mxu2 %v1125_v0 }
  0x39   :  { %672 = vmatpush.bf16.msrb.mxu3 %v1133_v1 }
  0x3a   :  { %634 = vmatpush.bf16.msrb.mxu0 %v1108_v2 }
  0x3b   :  { %647 = vmatpush.bf16.msrb.mxu1 %v1116_v3 }
  0x3c   :  { %660 = vmatpush.bf16.msrb.mxu2 %v1124_v5 }
  0x3d   :  { %673 = vmatpush.bf16.msrb.mxu3 %v1132_v6 }
  0x3e   :  { %635 = vmatpush.bf16.msrb.mxu0 %v1107_v10 }
  0x3f   :  { %648 = vmatpush.bf16.msrb.mxu1 %v1115_v11 }
  0x40   :  { %661 = vmatpush.bf16.msrb.mxu2 %v1123_v14 }
  0x41   :  { %674 = vmatpush.bf16.msrb.mxu3 %v1131_v15  ;;  %636 = vmatmul.bf16.vlgmr.msrb.gmra.mxu0 %v180_v16 }
  0x42   :  { %649 = vmatmul.bf16.vlgmr.msrb.gmra.mxu1 %v181_v17  ;;  %726 = vmatpush.bf16.msra.mxu0 %v720_v23 }
  0x43   :  { %662 = vmatmul.bf16.vlgmr.msrb.gmra.mxu2 %v182_v18  ;;  %773 = vmatpush.bf16.msra.mxu1 %v765_v43 }
  0x44   :  { %675 = vmatmul.bf16.vlgmr.msrb.gmra.mxu3 %v183_v19 }
  0x46   :  { %727 = vmatpush.bf16.msra.mxu0 %v1141_v25 }
  0x47   :  { %774 = vmatpush.bf16.msra.mxu1 %v1142_v44 }
  0x4a   :  { %728 = vmatpush.bf16.msra.mxu0 %v1140_v27 }
  0x4e   :  { %729 = vmatpush.bf16.msra.mxu0 %v1139_v31 }
  0x9e   :  { %v585_v24 = vpop.f32.mrf.mxu0 }
  0x9f   :  { %v598_v26 = vpop.f32.mrf.mxu1  ;;  %v586_v42 = vadd.f32 %v1146_v33, %v585_v24 }
  0xa1   :  { %v599_v45 = vadd.f32 %v598_v26, %v586_v42 }
  0xa6   :  { %v611_v28 = vpop.f32.mrf.mxu2  ;;  %v587_v30 = vpop.f32.mrf.mxu0 }
  0xa7   :  { %v624_v29 = vpop.f32.mrf.mxu3  ;;  %v600_v32 = vpop.f32.mrf.mxu1  ;;  %v612_v46 = vadd.f32 %v611_v28, %v599_v45 }
  0xa9   :  { %v625_v47 = vadd.f32 %v624_v29, %v612_v46 }
  0xae   :  { %v613_v36 = vpop.f32.mrf.mxu2 }
  0xaf   :  { %v626_v38 = vpop.f32.mrf.mxu3 }
  0xbe   :  { %v637_v48 = vpop.f32.mrf.mxu0 }
  0xbf   :  { %v650_v49 = vpop.f32.mrf.mxu1  ;;  %v638_v50 = vadd.f32 %v637_v48, %v625_v47 }
  0xc1   :  { %v651_v51 = vadd.f32 %v650_v49, %v638_v50 }
  0xc6   :  { %v663_v52 = vpop.f32.mrf.mxu2  ;;  %v639_v55 = vpop.f32.mrf.mxu0 }
  0xc7   :  { %v676_v53 = vpop.f32.mrf.mxu3  ;;  %v664_v54 = vadd.f32 %v663_v52, %v651_v51  ;;  %v652_v56 = vpop.f32.mrf.mxu1 }
  0xc9   :  { %v677_v57 = vadd.f32 %v676_v53, %v664_v54 }
  0xcb   :  { %v680_v58 = vmax.f32 %v677_v57, 0.0 }
  0xcd   :  { %v681_v59 = vpack.c.bf16 %v680_v58, %v680_v58 }
  0xce   :  { %v665_v60 = vpop.f32.mrf.mxu2 }
  0xcf   :  { %v678_v61 = vpop.f32.mrf.mxu3  ;;  %1065 = vmatmul.msk.bf16.vlgmr.msra.gmra.mxu0 %vm714_vm3, %v681_v59 }
 0x14c   :  { %v731_v63 = vpop.f32.mrf.mxu0 }
 0x14d   :  { %v732_v0 = vadd.f32 %v1147_v62, %v731_v63 }
 0x14f   :  { %v735_v1 = vmax.f32 %v732_v0, 0.0 }
 0x151   :  { %v736_v2 = vpack.c.bf16 %v735_v1, %v735_v1 }
 0x153   :  { %1074 = vmatmul.msk.bf16.vlgmr.msra.gmra.mxu1 %vm756_vm4, %v736_v2 }
 0x154   :  { %v733_v3 = vpop.f32.mrf.mxu0 }
 0x1d0   :  { %v776_v5 = vpop.f32.mrf.mxu1 }
 0x1d1   :  { %v777_v6 = vadd.f32 %v1148_v4, %v776_v5 }
 0x1d3   :  { %780 = vst [vmem:[#allocation2] sm:$0xff] %v777_v6 }
 0x1d4   :  { %791 = dma.vmem_to_hbm [thread:$0]  %s787_s15, 128, %s789_s18, [#allocation3]  }
 0x1d8   :  { %v778_v7 = vpop.f32.mrf.mxu1 }
 0x1d9   :  { %1173 = dma.done.wait [#allocation3], 128  }
 0x1da   :  { %1174 = vsyncadd [#allocation3], 4294967168 }
 0x1db   :  { %796 = vsyncpa [#allocation3], 1 }

</bundles_post_ra>
